<compile_context>
chip_gen: v7x
topology: tpu7x:2x2x1
jax: 0.10.0
libtpu: 0.0.40
codegen_flags: <defaults>
</compile_context>

<pallas_src>
import jax
import jax.numpy as jnp
from jax.experimental import pallas as pl
from jax.experimental.pallas import tpu as pltpu


def _round_up(x, m):
    return ((x + m - 1) // m) * m


def _linear_relu_kernel(x_ref, w_ref, b_ref, o_ref):
    # x_ref: (TM, K), w_ref: (TN, K), b_ref: (1, TN), o_ref: (TM, TN)
    acc = jax.lax.dot_general(
        x_ref[...], w_ref[...],
        dimension_numbers=(((1,), (1,)), ((), ())),   # contract K; trans_b on MXU
        preferred_element_type=jnp.float32,
    )
    acc = acc + b_ref[...]                            # (1, TN) broadcast over rows
    o_ref[...] = jnp.maximum(acc, 0.0).astype(o_ref.dtype)


def positional_encoding_forward(x, weight, bias, *, tile_m=None, tile_n=None,
                                compute_dtype=None):
    """x: (B, S, K); weight: (N, K) as in torch nn.Linear; bias: (N,)."""
    B, S, K = x.shape
    N = weight.shape[0]
    M = B * S
    out_dtype = x.dtype

    x2d = x.reshape(M, K)

    # ---- tile selection (MXU-aligned, VMEM-budgeted) ----
    if tile_m is None:
        if M >= 2048:
            tile_m = 512          # pipelined, multiple of 256 (v6e/v7x) and 128 (v5e)
        elif M >= 256:
            tile_m = 256
        else:
            tile_m = _round_up(M, 8)
    if tile_n is None:
        tile_n = min(_round_up(N, 128), 512)   # lane-dense output tile

    M_pad = _round_up(M, tile_m)
    N_pad = _round_up(N, tile_n)

    if M_pad != M:
        x2d = jnp.pad(x2d, ((0, M_pad - M), (0, 0)))
    w = weight
    b = bias
    if N_pad != N:
        w = jnp.pad(w, ((0, N_pad - N), (0, 0)))
        b = jnp.pad(b, ((0, N_pad - N),))
    b2d = b.reshape(1, N_pad)

    if compute_dtype is not None:              # e.g. jnp.bfloat16 for production
        x2d = x2d.astype(compute_dtype)
        w = w.astype(compute_dtype)

    grid = (M_pad // tile_m, N_pad // tile_n)

    # ---- explicit VMEM budget (double-buffered x/out/w tiles + bias) ----
    in_bytes = jnp.dtype(x2d.dtype).itemsize
    out_bytes = jnp.dtype(out_dtype).itemsize
    step_bytes = (2 * tile_m * K * in_bytes
                  + 2 * tile_n * K * in_bytes
                  + 2 * tile_m * tile_n * out_bytes
                  + 2 * tile_n * 4)
    vmem_limit = int(min(max(2 * step_bytes, 32 * 1024 * 1024), 64 * 1024 * 1024))

    cost = pl.CostEstimate(
        flops=2 * M_pad * K * N_pad,
        transcendentals=0,
        bytes_accessed=(M_pad * K + N_pad * K) * in_bytes + M_pad * N_pad * out_bytes,
    )

    out2d = pl.pallas_call(
        _linear_relu_kernel,
        out_shape=jax.ShapeDtypeStruct((M_pad, N_pad), out_dtype),
        grid_spec=pltpu.PrefetchScalarGridSpec(
            num_scalar_prefetch=0,
            grid=grid,
            in_specs=[
                pl.BlockSpec((tile_m, K), lambda i, j: (i, 0)),
                pl.BlockSpec((tile_n, K), lambda i, j: (j, 0)),
                pl.BlockSpec((1, tile_n), lambda i, j: (0, j)),
            ],
            out_specs=pl.BlockSpec((tile_m, tile_n), lambda i, j: (i, j)),
        ),
        compiler_params=pltpu.CompilerParams(
            dimension_semantics=("parallel", "parallel"),
            vmem_limit_bytes=vmem_limit,
        ),
        cost_estimate=cost,
    )(x2d, w, b2d)

    return out2d[:M, :N].reshape(B, S, N)


if __name__ == "__main__":
    # Small shapes consistent with the module: (batch, seq, input_dim) -> embed_dim
    batch, seq, input_dim, embed_dim = 2, 8, 32, 256

    key = jax.random.PRNGKey(0)
    kx, kw, kb = jax.random.split(key, 3)

    x = jax.random.normal(kx, (batch, seq, input_dim), dtype=jnp.float32)
    # nn.Linear-shaped parameters: weight (embed_dim, input_dim), bias (embed_dim,)
    bound = 1.0 / (input_dim ** 0.5)
    weight = jax.random.uniform(kw, (embed_dim, input_dim),
                                minval=-bound, maxval=bound, dtype=jnp.float32)
    bias = jax.random.uniform(kb, (embed_dim,),
                              minval=-bound, maxval=bound, dtype=jnp.float32)

    out = positional_encoding_forward(x, weight, bias)
    out = jax.block_until_ready(out)

    # Reference check in plain JAX (y = relu(x @ W.T + b)).
    ref = jnp.maximum(jnp.einsum("bsk,nk->bsn", x, weight) + bias, 0.0)
    assert out.shape == (batch, seq, embed_dim)
    assert jnp.allclose(out, ref, atol=1e-5, rtol=1e-5)

    # Also exercise a ragged / larger shape to validate padding + multi-step grid.
    x2 = jax.random.normal(kx, (3, 37, input_dim), dtype=jnp.float32)
    out2 = jax.block_until_ready(positional_encoding_forward(x2, weight, bias))
    ref2 = jnp.maximum(jnp.einsum("bsk,nk->bsn", x2, weight) + bias, 0.0)
    assert jnp.allclose(out2, ref2, atol=1e-5, rtol=1e-5)

    print("KERNEL_OK")
</pallas_src>

<mosaic_0001>
module attributes {stable_mosaic.version = 11 : i64} {
  func.func @_linear_relu_kernel(%arg0: i32, %arg1: i32, %arg2: memref<16x32xf32, #tpu.memory_space<vmem>>, %arg3: memref<256x32xf32, #tpu.memory_space<vmem>>, %arg4: memref<1x256xf32, #tpu.memory_space<vmem>>, %arg5: memref<16x256xf32, #tpu.memory_space<vmem>>) attributes {dimension_semantics = [#tpu.dimension_semantics<parallel>, #tpu.dimension_semantics<parallel>], iteration_bounds = array<i64: 1, 1>, scalar_prefetch = 0 : i64, scratch_operands = 0 : i64, tpu.core_type = #tpu.core_type<tc>, window_params = [{transform_indices = @transform_0, window_bounds = array<i64: 16, 32>}, {transform_indices = @transform_1, window_bounds = array<i64: 256, 32>}, {transform_indices = @transform_2, window_bounds = array<i64: 1, 256>}, {transform_indices = @transform_3, window_bounds = array<i64: 16, 256>}]} {
    %c0 = arith.constant 0 : index
    %c0_0 = arith.constant 0 : index
    %0 = vector.load %arg2[%c0, %c0_0] : memref<16x32xf32, #tpu.memory_space<vmem>>, vector<16x32xf32>
    %c0_1 = arith.constant 0 : index
    %c0_2 = arith.constant 0 : index
    %1 = vector.load %arg3[%c0_1, %c0_2] : memref<256x32xf32, #tpu.memory_space<vmem>>, vector<256x32xf32>
    %cst = arith.constant dense<0.000000e+00> : vector<16x256xf32>
    %2 = tpu.matmul %0, %1, %cst {dimension_numbers = #tpu.dot_dimension_numbers<[1], [1], [0], [0], [0, 0, 1, 0], [], []>} : vector<16x32xf32>, vector<256x32xf32>, vector<16x256xf32> -> vector<16x256xf32>
    %c0_3 = arith.constant 0 : index
    %c0_4 = arith.constant 0 : index
    %3 = vector.load %arg4[%c0_3, %c0_4] : memref<1x256xf32, #tpu.memory_space<vmem>>, vector<1x256xf32>
    %4 = vector.broadcast %3 : vector<1x256xf32> to vector<16x256xf32>
    %5 = arith.addf %2, %4 : vector<16x256xf32>
    %cst_5 = arith.constant 0.000000e+00 : f32
    %6 = vector.broadcast %cst_5 : f32 to vector<16x256xf32>
    %7 = arith.maximumf %5, %6 : vector<16x256xf32>
    %c0_6 = arith.constant 0 : index
    %c0_7 = arith.constant 0 : index
    %8 = vector.load %arg5[%c0_6, %c0_7] : memref<16x256xf32, #tpu.memory_space<vmem>>, vector<16x256xf32>
    tpu.vector_store %arg5[%c0_6, %c0_7], %7 {strides = array<i32>} : memref<16x256xf32, #tpu.memory_space<vmem>>, vector<16x256xf32>,
    return
  }
  func.func @transform_0(%arg0: i32, %arg1: i32) -> (i32, i32) {
    %c0_i32 = arith.constant 0 : i32
    %c0_i32_0 = arith.constant 0 : i32
    return %arg0, %c0_i32 : i32, i32
  }
  func.func @transform_1(%arg0: i32, %arg1: i32) -> (i32, i32) {
    %c0_i32 = arith.constant 0 : i32
    %c0_i32_0 = arith.constant 0 : i32
    return %arg1, %c0_i32 : i32, i32
  }
  func.func @transform_2(%arg0: i32, %arg1: i32) -> (i32, i32) {
    %c0_i32 = arith.constant 0 : i32
    %c0_i32_0 = arith.constant 0 : i32
    return %c0_i32, %arg1 : i32, i32
  }
  func.func @transform_3(%arg0: i32, %arg1: i32) -> (i32, i32) {
    %c0_i32 = arith.constant 0 : i32
    return %arg0, %arg1 : i32, i32
  }
}

</mosaic_0001>

<bundles_post_ra>
// kernel: tpu_custom_call.1
= control target key start
LH: loop header
LB: loop body
LE: loop exit
PB: predicated region body
PF: predicated region fallthrough
CT: control target
= control target key end

     0   :  { %vm61_vm0 = vcmask 261120   ;;  %s648_s0 = inlined_call_operand.vmem [shape: f32[16,32], index: 0, kind: input, shape index: {}]   ;;  %s649_s1 = inlined_call_operand.vmem [shape: f32[256,32], index: 1, kind: input, shape index: {}]   ;;  %s650_s2 = inlined_call_operand.vmem [shape: f32[1,256], index: 2, kind: input, shape index: {}]   ;;  %s651_s3 = inlined_call_operand.hbm [shape: f32[16,256], index: 3, kind: output, shape index: {}]  }
   0x1   :  { %v33_v0 = vld [vmem:[%s649_s1 + $0x80] sm:$0xff]  ;;  %v34_v1 = vld [vmem:[%s649_s1 + $0x88] sm:$0xff]  ;;  %vm460_vm1 = vmpackc.low %vm61_vm0, %vm61_vm0 }
   0x2   :  { %v17_v2 = vld [vmem:[%s649_s1] sm:$0xff]  ;;  %v335_v3 = vpack.c.bf16 %v34_v1, %v33_v0  ;;  %v18_v5 = vld [vmem:[%s649_s1 + $0x8] sm:$0xff]  ;;  %v35_v6 = vld [vmem:[%s649_s1 + $0x90] sm:$0xff] }
   0x3   :  { %v338_v7 = vpack.c.bf16 %v18_v5, %v17_v2  ;;  %v36_v8 = vld [vmem:[%s649_s1 + $0x98] sm:$0xff]  ;;  %v19_v10 = vld [vmem:[%s649_s1 + $0x10] sm:$0xff]  ;;  %v37_v12 = vld [vmem:[%s649_s1 + $0xa0] sm:$0xff] }
   0x4   :  { %337 = vmatprep.subr.msk.bf16.mxu0 %vm460_vm1, %v335_v3  ;;  %383 = vmatprep.subr.msk.bf16.mxu1 %vm460_vm1, %v335_v3  ;;  %v341_v9 = vpack.c.bf16 %v36_v8, %v35_v6  ;;  %v20_v11 = vld [vmem:[%s649_s1 + $0x18] sm:$0xff]  ;;  %v38_v13 = vld [vmem:[%s649_s1 + $0xa8] sm:$0xff]  ;;  %v500_v16 = vld [vmem:[%s648_s0] sm:$0xff] }
   0x5   :  { %340 = vmatpush3.bf16.xpose.msk.msra.mxu0 %vm460_vm1, %v338_v7  ;;  %391 = vmatpush3.bf16.xpose.msk.msra.mxu1 %vm460_vm1, %v338_v7  ;;  %v344_v14 = vpack.c.bf16 %v20_v11, %v19_v10  ;;  %v347_v15 = vpack.c.bf16 %v38_v13, %v37_v12  ;;  %v505_v17 = vld [vmem:[%s648_s0 + $0x8] sm:$0xff] }
   0x6   :  { %343 = vmatprep.subr.msk.bf16.mxu0 %vm460_vm1, %v341_v9  ;;  %384 = vmatprep.subr.msk.bf16.mxu1 %vm460_vm1, %v341_v9 }
   0xd   :  { %346 = vmatpush3.bf16.xpose.msk.msra.mxu0 %vm460_vm1, %v344_v14  ;;  %392 = vmatpush3.bf16.xpose.msk.msra.mxu1 %vm460_vm1, %v344_v14 }
   0xe   :  { %8 = vsyncpa [#allocation3], 0  ;;  %349 = vmatprep.subr.msk.bf16.mxu0 %vm460_vm1, %v347_v15  ;;  %385 = vmatprep.subr.msk.bf16.mxu1 %vm460_vm1, %v347_v15  ;;  %v21_v18 = vld [vmem:[%s649_s1 + $0x20] sm:$0xff]  ;;  %v22_v19 = vld [vmem:[%s649_s1 + $0x28] sm:$0xff]  ;;  %v51_v51 = vlaneseq }
   0xf   :  { %v39_v20 = vld [vmem:[%s649_s1 + $0xb0] sm:$0xff]  ;;  %v40_v21 = vld [vmem:[%s649_s1 + $0xb8] sm:$0xff]  ;;  %331 = vmatprep.mubr.msk.f32.mxu0 %vm61_vm0, %v500_v16  ;;  %333 = vmatprep.mubr.msk.f32.mxu1 %vm61_vm0, %v505_v17  ;;  %v350_v22 = vpack.c.bf16 %v22_v19, %v21_v18  ;;  %v41_v26 = vld [vmem:[%s649_s1 + $0xc0] sm:$0xff] }
  0x10   :  { %v353_v23 = vpack.c.bf16 %v40_v21, %v39_v20  ;;  %v23_v24 = vld [vmem:[%s649_s1 + $0x30] sm:$0xff]  ;;  %v24_v25 = vld [vmem:[%s649_s1 + $0x38] sm:$0xff]  ;;  %v42_v27 = vld [vmem:[%s649_s1 + $0xc8] sm:$0xff]  ;;  %v52_v52 = vshrl.u32 %v51_v51, 7 }
  0x11   :  { %v356_v28 = vpack.c.bf16 %v24_v25, %v23_v24  ;;  %v359_v29 = vpack.c.bf16 %v42_v27, %v41_v26  ;;  %v25_v30 = vld [vmem:[%s649_s1 + $0x40] sm:$0xff]  ;;  %v26_v31 = vld [vmem:[%s649_s1 + $0x48] sm:$0xff]  ;;  %v43_v32 = vld [vmem:[%s649_s1 + $0xd0] sm:$0xff] }
  0x12   :  { %v44_v33 = vld [vmem:[%s649_s1 + $0xd8] sm:$0xff]  ;;  %v362_v34 = vpack.c.bf16 %v26_v31, %v25_v30  ;;  %v27_v36 = vld [vmem:[%s649_s1 + $0x50] sm:$0xff]  ;;  %v45_v38 = vld [vmem:[%s649_s1 + $0xe0] sm:$0xff]  ;;  %v53_v53 = vsub.s32 0, %v52_v52  ;;  %v57_v55 = vsub.s32 1, %v52_v52 }
  0x13   :  { %v365_v35 = vpack.c.bf16 %v44_v33, %v43_v32  ;;  %v28_v37 = vld [vmem:[%s649_s1 + $0x58] sm:$0xff]  ;;  %v46_v39 = vld [vmem:[%s649_s1 + $0xe8] sm:$0xff]  ;;  %v29_v42 = vld [vmem:[%s649_s1 + $0x60] sm:$0xff] }
  0x14   :  { %v368_v40 = vpack.c.bf16 %v28_v37, %v27_v36  ;;  %v371_v41 = vpack.c.bf16 %v46_v39, %v45_v38  ;;  %v30_v43 = vld [vmem:[%s649_s1 + $0x68] sm:$0xff]  ;;  %v47_v44 = vld [vmem:[%s649_s1 + $0xf0] sm:$0xff]  ;;  %v48_v45 = vld [vmem:[%s649_s1 + $0xf8] sm:$0xff] }
  0x15   :  { %352 = vmatpush3.bf16.xpose.msk.msra.mxu0 %vm460_vm1, %v350_v22  ;;  %393 = vmatpush3.bf16.xpose.msk.msra.mxu1 %vm460_vm1, %v350_v22  ;;  %v374_v46 = vpack.c.bf16 %v30_v43, %v29_v42  ;;  %v377_v47 = vpack.c.bf16 %v48_v45, %v47_v44  ;;  %v31_v48 = vld [vmem:[%s649_s1 + $0x70] sm:$0xff]  ;;  %v32_v49 = vld [vmem:[%s649_s1 + $0x78] sm:$0xff]  ;;  %v49_v54 = vld [vmem:[%s650_s2] sm:$0x3]  ;;  %s426_s1 = smov [#allocation2]  }
  0x16   :  { %355 = vmatprep.subr.msk.bf16.mxu0 %vm460_vm1, %v353_v23  ;;  %386 = vmatprep.subr.msk.bf16.mxu1 %vm460_vm1, %v353_v23  ;;  %v380_v50 = vpack.c.bf16 %v32_v49, %v31_v48  ;;  %v54_v56 = vrot.slane %v49_v54, %v53_v53  ;;  %v58_v57 = vrot.slane %v49_v54, %v57_v55  ;;  %s254_s26 = sshll.u32 %s426_s1, 4  ;;  %s255_s26 = int_to_ptr.vmem [resolvable:$true] %s254_s26 }
  0x17   :  { %s402_s2 = scalar_lea.vmem %s255_s26, 512  ;;  %p407_p1 = scmp.lt.s32.totalorder %s255_s26, %s255_s26 }
  0x18   :  { %p403_p0 = scmp.ne.s32.totalorder %s255_s26, %s402_s2  ;;  %p408_p2 = scmp.lt.s32.totalorder %s402_s2, %s402_s2 }
  0x1a   :  { %p409_p3 = por %p408_p2, %p407_p1 }
  0x1c   :  { %p410_p4 = pnand %p409_p3, %p403_p0 }
  0x1d   :  { %358 = vmatpush3.bf16.xpose.msk.msra.mxu0 %vm460_vm1, %v356_v28  ;;  %394 = vmatpush3.bf16.xpose.msk.msra.mxu1 %vm460_vm1, %v356_v28 }
  0x1e   :  { %361 = vmatprep.subr.msk.bf16.mxu0 %vm460_vm1, %v359_v29  ;;  %387 = vmatprep.subr.msk.bf16.mxu1 %vm460_vm1, %v359_v29 }
  0x25   :  { %364 = vmatpush3.bf16.xpose.msk.msra.mxu0 %vm460_vm1, %v362_v34  ;;  %395 = vmatpush3.bf16.xpose.msk.msra.mxu1 %vm460_vm1, %v362_v34 }
  0x26   :  { %367 = vmatprep.subr.msk.bf16.mxu0 %vm460_vm1, %v365_v35  ;;  %388 = vmatprep.subr.msk.bf16.mxu1 %vm460_vm1, %v365_v35 }
  0x2d   :  { %370 = vmatpush3.bf16.xpose.msk.msra.mxu0 %vm460_vm1, %v368_v40  ;;  %396 = vmatpush3.bf16.xpose.msk.msra.mxu1 %vm460_vm1, %v368_v40 }
  0x2e   :  { %373 = vmatprep.subr.msk.bf16.mxu0 %vm460_vm1, %v371_v41  ;;  %389 = vmatprep.subr.msk.bf16.mxu1 %vm460_vm1, %v371_v41 }
  0x35   :  { %376 = vmatpush3.bf16.xpose.msk.msra.mxu0 %vm460_vm1, %v374_v46  ;;  %397 = vmatpush3.bf16.xpose.msk.msra.mxu1 %vm460_vm1, %v374_v46 }
  0x36   :  { %379 = vmatprep.subr.msk.bf16.mxu0 %vm460_vm1, %v377_v47  ;;  %390 = vmatprep.subr.msk.bf16.mxu1 %vm460_vm1, %v377_v47 }
  0x3d   :  { %382 = vmatpush3.bf16.xpose.msk.msra.mxu0 %vm460_vm1, %v380_v50  ;;  %398 = vmatpush3.bf16.xpose.msk.msra.mxu1 %vm460_vm1, %v380_v50 }
  0x44   :  { %332 = vmatmul.mubr.msk.f32.vlgmr.msra.gmra.mrb[0].mxu0 %vm61_vm0, %v500_v16  ;;  %334 = vmatmul.mubr.msk.f32.vlgmr.msra.gmra.mrb[0].mxu1 %vm61_vm0, %v505_v17 }
 0x117   :  { %v230_v58 = vpop.f32.mrb[0].mxu0  ;;  %v236_v59 = vpop.f32.mrb[0].mxu1 }
 0x118   :  { %v231_v60 = vadd.f32 %v230_v58, %v54_v56  ;;  %v237_v61 = vadd.f32 %v236_v59, %v54_v56  ;;  %v232_v62 = vpop.f32.mrb[1].mxu0  ;;  %v238_v63 = vpop.f32.mrb[1].mxu1 }
 0x119   :  { %v233_v0 = vadd.f32 %v232_v62, %v58_v57  ;;  %v239_v1 = vadd.f32 %v238_v63, %v58_v57 }
 0x11a   :  { %v241_v2 = vmax.f32 %v231_v60, 0.0  ;;  %v243_v3 = vmax.f32 %v237_v61, 0.0 }
 0x11b   :  { %v242_v4 = vmax.f32 %v233_v0, 0.0  ;;  %v244_v5 = vmax.f32 %v239_v1, 0.0 }
 0x11c   :  { %245 = vst [vmem:[#allocation2] sm:$0xff] %v241_v2  ;;  %247 = vst [vmem:[#allocation2 + $0x10] sm:$0xff] %v243_v3 }
 0x11d   :  { %246 = vst [vmem:[#allocation2 + $0x8] sm:$0xff] %v242_v4  ;;  %248 = vst [vmem:[#allocation2 + $0x18] sm:$0xff] %v244_v5 }
 0x11e   :  { %413 = shalt.err (!%p410_p4)
}
 0x11f   :  { %s414_s29 = scalar_lea.hbm %s651_s3, 512 }
 0x120   :  { %p415_p5 = scmp.ne.s32.totalorder %s651_s3, %s414_s29  ;;  %p418_p6 = scmp.lt.u32.totalorder %s414_s29, %s651_s3 }
 0x122   :  { %p420_p7 = pnand %p418_p6, %p415_p5 }
 0x124   :  { %423 = shalt.err (!%p420_p7)
}
 0x125   :  { %s427_s7 = smov 256   ;;  %s428_s8 = smov 16  }
 0x126   :  { %260 = dma.vmem_to_hbm [thread:$0]  %s255_s26, 512, %s651_s3, [#allocation3], %s427_s7, %s427_s7, %s428_s8  }
 0x127   :  { %424 = dma.done.wait [#allocation3], 512  }
 0x128   :  { %425 = vsyncadd [#allocation3], 4294966784 }
 0x129   :  { %264 = vsyncpa [#allocation3], 1 }

</bundles_post_ra>
